<compile_context>
chip_gen: v7x
topology: tpu7x:2x2x1
jax: 0.10.0
libtpu: 0.0.40
codegen_flags: <defaults>
</compile_context>

<pallas_src>
import functools
import math

import jax
import jax.numpy as jnp
import numpy as np
from jax import lax
from jax.experimental import pallas as pl
from jax.experimental.pallas import tpu as pltpu

LAYER_NORM_EPS = 1e-7        # DeBERTa-v2 default layer_norm_eps
IGNORE_INDEX = -100
NEG_INF_BIAS = -1e30         # bias for padded vocab columns


def _round_up(x, m):
    return ((x + m - 1) // m) * m


# ----------------------------------------------------------------------------
# Fused kernel: MLM head + cross-entropy stats
#   grid = (N_pad // tm, V_pad // tn);  j (vocab) is the inner/"arbitrary" axis.
# ----------------------------------------------------------------------------
def _mlm_head_kernel(x_ref, w1_ref, b1_ref, gamma_ref, beta_ref,
                     w2_ref, b2_ref, lab_ref,
                     logits_ref, rowloss_ref,
                     h_sc, m_sc, l_sc, ll_sc,
                     *, compute_dtype):
    j = pl.program_id(1)
    nj = pl.num_programs(1)
    tn = logits_ref.shape[-1]

    # ---- once per row tile: dense -> gelu -> LayerNorm, init CE accumulators
    @pl.when(j == 0)
    def _():
        x = x_ref[...].astype(compute_dtype)
        h = jnp.dot(x, w1_ref[...].astype(compute_dtype),
                    preferred_element_type=jnp.float32)
        h = h + b1_ref[...].astype(jnp.float32)
        # gelu (erf form; matches torch gelu / gelu_python)
        h = h * 0.5 * (1.0 + lax.erf(h * np.float32(1.0 / math.sqrt(2.0))))
        # LayerNorm over last dim, single pass: var = E[x^2] - mu^2
        mu = jnp.mean(h, axis=-1, keepdims=True)
        ex2 = jnp.mean(h * h, axis=-1, keepdims=True)
        var = ex2 - mu * mu
        h = (h - mu) * lax.rsqrt(var + LAYER_NORM_EPS)
        h = h * gamma_ref[...].astype(jnp.float32) + beta_ref[...].astype(jnp.float32)
        h_sc[...] = h

        m_sc[...] = jnp.full_like(m_sc, -jnp.inf)
        l_sc[...] = jnp.zeros_like(l_sc)
        ll_sc[...] = jnp.zeros_like(ll_sc)

    # ---- decoder matmul for this vocab tile
    h = h_sc[...]
    logits = jnp.dot(h.astype(compute_dtype), w2_ref[...].astype(compute_dtype),
                     preferred_element_type=jnp.float32)
    logits = logits + b2_ref[...].astype(jnp.float32)
    logits_ref[...] = logits.astype(logits_ref.dtype)

    # ---- fused cross-entropy: online log-sum-exp + label-logit gather
    labels = lab_ref[...]                                       # (tm, 1) int32
    tile_max = jnp.max(logits, axis=-1, keepdims=True)
    m_new = jnp.maximum(m_sc[...], tile_max)
    scale = jnp.exp(m_sc[...] - m_new)
    l_sc[...] = l_sc[...] * scale + jnp.sum(jnp.exp(logits - m_new),
                                            axis=-1, keepdims=True)
    m_sc[...] = m_new

    col = lax.broadcasted_iota(jnp.int32, logits.shape, 1) + j * tn
    onehot = (col == labels).astype(jnp.float32)
    ll_sc[...] = ll_sc[...] + jnp.sum(logits * onehot, axis=-1, keepdims=True)

    # ---- finalize per-row loss on the last vocab tile
    @pl.when(j == nj - 1)
    def _():
        lse = m_sc[...] + jnp.log(l_sc[...])
        valid = (lab_ref[...] != IGNORE_INDEX).astype(jnp.float32)
        rowloss_ref[...] = (lse - ll_sc[...]) * valid


# ----------------------------------------------------------------------------
# Wrapper
# ----------------------------------------------------------------------------
def mlm_forward(sequence_output, params, labels=None, *,
                tm=256, tn=512, compute_dtype=None):
    """sequence_output: [B, S, H]; labels: [B, S] int32 or None.

    Returns (prediction_scores [B, S, V], masked_lm_loss or None).
    For production DeBERTa-v2 shapes pass compute_dtype=jnp.bfloat16 and tune
    tm/tn for the target generation's VMEM (tn<=1024 on v7x, larger on v6e/v5e).
    """
    B, S, H = sequence_output.shape
    V = params["decoder_w"].shape[1]
    N = B * S
    if compute_dtype is None:
        compute_dtype = sequence_output.dtype

    # Tile sizes (tm multiple of 8, tn multiple of 128; clipped to problem size).
    tm = min(tm, _round_up(N, 8))
    tn = min(tn, _round_up(V, 128))
    N_pad = _round_up(N, tm)
    V_pad = _round_up(V, tn)

    x = sequence_output.reshape(N, H).astype(jnp.float32)
    if N_pad != N:
        x = jnp.pad(x, ((0, N_pad - N), (0, 0)))

    if labels is None:
        labels_flat = jnp.full((N,), IGNORE_INDEX, jnp.int32)
    else:
        labels_flat = labels.reshape(N).astype(jnp.int32)
    labels_p = labels_flat
    if N_pad != N:
        labels_p = jnp.pad(labels_flat, (0, N_pad - N),
                           constant_values=IGNORE_INDEX)
    labels2d = labels_p.reshape(N_pad, 1)

    w1 = params["dense_w"]
    b1 = params["dense_b"].reshape(1, H)
    gamma = params["ln_gamma"].reshape(1, H)
    beta = params["ln_beta"].reshape(1, H)
    w2 = params["decoder_w"]
    b2 = params["decoder_b"].reshape(1, V)
    if V_pad != V:
        w2 = jnp.pad(w2, ((0, 0), (0, V_pad - V)))
        b2 = jnp.pad(b2, ((0, 0), (0, V_pad - V)), constant_values=NEG_INF_BIAS)

    grid = (N_pad // tm, V_pad // tn)
    kernel = functools.partial(_mlm_head_kernel, compute_dtype=compute_dtype)

    logits, rowloss = pl.pallas_call(
        kernel,
        out_shape=(jax.ShapeDtypeStruct((N_pad, V_pad), jnp.float32),
                   jax.ShapeDtypeStruct((N_pad, 1), jnp.float32)),
        grid_spec=pltpu.PrefetchScalarGridSpec(
            num_scalar_prefetch=0,
            grid=grid,
            in_specs=[
                pl.BlockSpec((tm, H), lambda i, j: (i, 0)),     # x rows
                pl.BlockSpec((H, H), lambda i, j: (0, 0)),      # dense W
                pl.BlockSpec((1, H), lambda i, j: (0, 0)),      # dense b
                pl.BlockSpec((1, H), lambda i, j: (0, 0)),      # LN gamma
                pl.BlockSpec((1, H), lambda i, j: (0, 0)),      # LN beta
                pl.BlockSpec((H, tn), lambda i, j: (0, j)),     # decoder W (streamed)
                pl.BlockSpec((1, tn), lambda i, j: (0, j)),     # decoder bias
                pl.BlockSpec((tm, 1), lambda i, j: (i, 0)),     # labels
            ],
            out_specs=[
                pl.BlockSpec((tm, tn), lambda i, j: (i, j)),    # logits
                pl.BlockSpec((tm, 1), lambda i, j: (i, 0)),     # per-row CE loss
            ],
            scratch_shapes=[
                pltpu.VMEM((tm, H), jnp.float32),               # h (post-LN)
                pltpu.VMEM((tm, 1), jnp.float32),               # running max
                pltpu.VMEM((tm, 1), jnp.float32),               # running sum-exp
                pltpu.VMEM((tm, 1), jnp.float32),               # label logit
            ],
        ),
        compiler_params=pltpu.CompilerParams(
            dimension_semantics=("parallel", "arbitrary"),
            vmem_limit_bytes=64 * 1024 * 1024,
        ),
    )(x, w1, b1, gamma, beta, w2, b2, labels2d)

    prediction_scores = logits[:N, :V].reshape(B, S, V)

    masked_lm_loss = None
    if labels is not None:
        valid = (labels_flat != IGNORE_INDEX).astype(jnp.float32)
        count = jnp.sum(valid)
        total = jnp.sum(rowloss[:N, 0])
        masked_lm_loss = jnp.where(count > 0, total / jnp.maximum(count, 1.0), 0.0)

    return prediction_scores, masked_lm_loss


# ----------------------------------------------------------------------------
# Pure-JAX reference for verification
# ----------------------------------------------------------------------------
def reference_forward(sequence_output, params, labels):
    B, S, H = sequence_output.shape
    V = params["decoder_w"].shape[1]
    x = sequence_output.reshape(-1, H)
    h = x @ params["dense_w"] + params["dense_b"].reshape(1, H)
    h = h * 0.5 * (1.0 + lax.erf(h / math.sqrt(2.0)))
    mu = h.mean(-1, keepdims=True)
    var = ((h - mu) ** 2).mean(-1, keepdims=True)
    h = (h - mu) / jnp.sqrt(var + LAYER_NORM_EPS)
    h = h * params["ln_gamma"].reshape(1, H) + params["ln_beta"].reshape(1, H)
    logits = h @ params["decoder_w"] + params["decoder_b"].reshape(1, V)
    lab = labels.reshape(-1)
    lse = jax.nn.logsumexp(logits, axis=-1)
    ll = jnp.take_along_axis(logits, lab[:, None], axis=-1)[:, 0]
    valid = (lab != IGNORE_INDEX).astype(jnp.float32)
    loss = jnp.sum((lse - ll) * valid) / jnp.maximum(jnp.sum(valid), 1.0)
    return logits.reshape(B, S, V), loss


if __name__ == "__main__":
    # Small shapes consistent with the module: batch=2, seq=8, hidden=32, vocab=256
    # (tm=8, tn=128 exercises a real 2x2 grid with streamed decoder tiles).
    B, S, H, V = 2, 8, 32, 256

    key = jax.random.PRNGKey(0)
    ks = jax.random.split(key, 8)

    params = {
        "dense_w":   (0.02 * jax.random.normal(ks[0], (H, H))).astype(jnp.float32),
        "dense_b":   (0.01 * jax.random.normal(ks[4], (H,))).astype(jnp.float32),
        "ln_gamma":  jnp.ones((H,), jnp.float32),
        "ln_beta":   jnp.zeros((H,), jnp.float32),
        "decoder_w": (0.02 * jax.random.normal(ks[1], (H, V))).astype(jnp.float32),
        "decoder_b": jnp.zeros((V,), jnp.float32),  # self.bias = zeros(vocab_size)
    }

    sequence_output = jax.random.normal(ks[2], (B, S, H), jnp.float32)
    labels = jax.random.randint(ks[3], (B, S), 0, V, dtype=jnp.int32)
    # sprinkle a few ignored positions to exercise the -100 mask
    labels = labels.at[0, 0].set(IGNORE_INDEX).at[1, 3].set(IGNORE_INDEX)

    scores, loss = mlm_forward(sequence_output, params, labels, tm=8, tn=128)
    jax.block_until_ready((scores, loss))

    ref_scores, ref_loss = reference_forward(sequence_output, params, labels)
    np.testing.assert_allclose(np.asarray(scores), np.asarray(ref_scores),
                               rtol=1e-4, atol=1e-4)
    np.testing.assert_allclose(float(loss), float(ref_loss), rtol=1e-4, atol=1e-4)

    # scores-only path (labels=None) must also run
    scores2, loss2 = mlm_forward(sequence_output, params, None, tm=8, tn=128)
    jax.block_until_ready(scores2)
    assert loss2 is None
    np.testing.assert_allclose(np.asarray(scores2), np.asarray(ref_scores),
                               rtol=1e-4, atol=1e-4)

    print("KERNEL_OK")
</pallas_src>

<mosaic_0001>
module attributes {stable_mosaic.version = 11 : i64} {
  func.func @_mlm_head_kernel(%arg0: i32, %arg1: i32, %arg2: memref<8x32xf32, #tpu.memory_space<vmem>>, %arg3: memref<32x32xf32, #tpu.memory_space<vmem>>, %arg4: memref<1x32xf32, #tpu.memory_space<vmem>>, %arg5: memref<1x32xf32, #tpu.memory_space<vmem>>, %arg6: memref<1x32xf32, #tpu.memory_space<vmem>>, %arg7: memref<32x128xf32, #tpu.memory_space<vmem>>, %arg8: memref<1x128xf32, #tpu.memory_space<vmem>>, %arg9: memref<8x1xi32, #tpu.memory_space<vmem>>, %arg10: memref<8x128xf32, #tpu.memory_space<vmem>>, %arg11: memref<8x1xf32, #tpu.memory_space<vmem>>, %arg12: memref<8x32xf32, #tpu.memory_space<vmem>>, %arg13: memref<8x1xf32, #tpu.memory_space<vmem>>, %arg14: memref<8x1xf32, #tpu.memory_space<vmem>>, %arg15: memref<8x1xf32, #tpu.memory_space<vmem>>) attributes {dimension_semantics = [#tpu.dimension_semantics<parallel>, #tpu.dimension_semantics<arbitrary>], iteration_bounds = array<i64: 2, 2>, scalar_prefetch = 0 : i64, scratch_operands = 4 : i64, tpu.core_type = #tpu.core_type<tc>, window_params = [{transform_indices = @transform_0, window_bounds = array<i64: 8, 32>}, {pipeline_mode = #tpu.pipeline_mode<synchronous>, transform_indices = @transform_1, window_bounds = array<i64: 32, 32>}, {pipeline_mode = #tpu.pipeline_mode<synchronous>, transform_indices = @transform_2, window_bounds = array<i64: 1, 32>}, {pipeline_mode = #tpu.pipeline_mode<synchronous>, transform_indices = @transform_3, window_bounds = array<i64: 1, 32>}, {pipeline_mode = #tpu.pipeline_mode<synchronous>, transform_indices = @transform_4, window_bounds = array<i64: 1, 32>}, {transform_indices = @transform_5, window_bounds = array<i64: 32, 128>}, {transform_indices = @transform_6, window_bounds = array<i64: 1, 128>}, {transform_indices = @transform_7, window_bounds = array<i64: 8, 1>}, {transform_indices = @transform_8, window_bounds = array<i64: 8, 128>}, {transform_indices = @transform_9, window_bounds = array<i64: 8, 1>}]} {
    %c0_i32 = arith.constant 0 : i32
    %0 = arith.cmpi eq, %arg1, %c0_i32 : i32
    %1 = arith.extui %0 : i1 to i32
    %c0_i32_0 = arith.constant 0 : i32
    %2 = arith.cmpi ne, %1, %c0_i32_0 : i32
    scf.if %2 {
      %c0_28 = arith.constant 0 : index
      %c0_29 = arith.constant 0 : index
      %45 = vector.load %arg2[%c0_28, %c0_29] : memref<8x32xf32, #tpu.memory_space<vmem>>, vector<8x32xf32>
      %c0_30 = arith.constant 0 : index
      %c0_31 = arith.constant 0 : index
      %46 = vector.load %arg3[%c0_30, %c0_31] : memref<32x32xf32, #tpu.memory_space<vmem>>, vector<32x32xf32>
      %cst_32 = arith.constant dense<0.000000e+00> : vector<8x32xf32>
      %47 = tpu.matmul %45, %46, %cst_32 {dimension_numbers = #tpu.dot_dimension_numbers<[1], [0], [0], [1], [0, 0, 1, 1], [], []>} : vector<8x32xf32>, vector<32x32xf32>, vector<8x32xf32> -> vector<8x32xf32>
      %c0_33 = arith.constant 0 : index
      %c0_34 = arith.constant 0 : index
      %48 = vector.load %arg4[%c0_33, %c0_34] : memref<1x32xf32, #tpu.memory_space<vmem>>, vector<1x32xf32>
      %49 = vector.broadcast %48 : vector<1x32xf32> to vector<8x32xf32>
      %50 = arith.addf %47, %49 : vector<8x32xf32>
      %cst_35 = arith.constant 5.000000e-01 : f32
      %51 = vector.broadcast %cst_35 : f32 to vector<8x32xf32>
      %52 = arith.mulf %50, %51 : vector<8x32xf32>
      %cst_36 = arith.constant 0.707106769 : f32
      %53 = vector.broadcast %cst_36 : f32 to vector<8x32xf32>
      %54 = arith.mulf %50, %53 : vector<8x32xf32>
      %55 = math.erf %54 : vector<8x32xf32>
      %cst_37 = arith.constant 1.000000e+00 : f32
      %56 = vector.broadcast %cst_37 : f32 to vector<8x32xf32>
      %57 = arith.addf %56, %55 : vector<8x32xf32>
      %58 = arith.mulf %52, %57 : vector<8x32xf32>
      %cst_38 = arith.constant dense<0.000000e+00> : vector<8xf32>
      %59 = vector.multi_reduction <add>, %58, %cst_38 [1] : vector<8x32xf32> to vector<8xf32>
      %60 = vector.shape_cast %59 : vector<8xf32> to vector<8x1xf32>
      %cst_39 = arith.constant 3.200000e+01 : f32
      %61 = vector.broadcast %cst_39 : f32 to vector<8x1xf32>
      %62 = arith.divf %60, %61 : vector<8x1xf32>
      %63 = arith.mulf %58, %58 : vector<8x32xf32>
      %cst_40 = arith.constant dense<0.000000e+00> : vector<8xf32>
      %64 = vector.multi_reduction <add>, %63, %cst_40 [1] : vector<8x32xf32> to vector<8xf32>
      %65 = vector.shape_cast %64 : vector<8xf32> to vector<8x1xf32>
      %cst_41 = arith.constant 3.200000e+01 : f32
      %66 = vector.broadcast %cst_41 : f32 to vector<8x1xf32>
      %67 = arith.divf %65, %66 : vector<8x1xf32>
      %68 = arith.mulf %62, %62 : vector<8x1xf32>
      %69 = arith.subf %67, %68 : vector<8x1xf32>
      %70 = vector.broadcast %62 : vector<8x1xf32> to vector<8x32xf32>
      %71 = arith.subf %58, %70 : vector<8x32xf32>
      %cst_42 = arith.constant 1.000000e-07 : f32
      %72 = vector.broadcast %cst_42 : f32 to vector<8x1xf32>
      %73 = arith.addf %69, %72 : vector<8x1xf32>
      %74 = math.rsqrt %73 : vector<8x1xf32>
      %75 = vector.broadcast %74 : vector<8x1xf32> to vector<8x32xf32>
      %76 = arith.mulf %71, %75 : vector<8x32xf32>
      %c0_43 = arith.constant 0 : index
      %c0_44 = arith.constant 0 : index
      %77 = vector.load %arg5[%c0_43, %c0_44] : memref<1x32xf32, #tpu.memory_space<vmem>>, vector<1x32xf32>
      %78 = vector.broadcast %77 : vector<1x32xf32> to vector<8x32xf32>
      %79 = arith.mulf %76, %78 : vector<8x32xf32>
      %c0_45 = arith.constant 0 : index
      %c0_46 = arith.constant 0 : index
      %80 = vector.load %arg6[%c0_45, %c0_46] : memref<1x32xf32, #tpu.memory_space<vmem>>, vector<1x32xf32>
      %81 = vector.broadcast %80 : vector<1x32xf32> to vector<8x32xf32>
      %82 = arith.addf %79, %81 : vector<8x32xf32>
      %c0_47 = arith.constant 0 : index
      %c0_48 = arith.constant 0 : index
      %83 = vector.load %arg12[%c0_47, %c0_48] : memref<8x32xf32, #tpu.memory_space<vmem>>, vector<8x32xf32>
      tpu.vector_store %arg12[%c0_47, %c0_48], %82 {strides = array<i32>} : memref<8x32xf32, #tpu.memory_space<vmem>>, vector<8x32xf32>,
      %cst_49 = arith.constant 0xFF800000 : f32
      %84 = vector.broadcast %cst_49 : f32 to vector<8x1xf32>
      %c0_50 = arith.constant 0 : index
      %c0_51 = arith.constant 0 : index
      %85 = vector.load %arg13[%c0_50, %c0_51] : memref<8x1xf32, #tpu.memory_space<vmem>>, vector<8x1xf32>
      tpu.vector_store %arg13[%c0_50, %c0_51], %84 {strides = array<i32>} : memref<8x1xf32, #tpu.memory_space<vmem>>, vector<8x1xf32>,
      %cst_52 = arith.constant 0.000000e+00 : f32
      %86 = vector.broadcast %cst_52 : f32 to vector<8x1xf32>
      %c0_53 = arith.constant 0 : index
      %c0_54 = arith.constant 0 : index
      %87 = vector.load %arg14[%c0_53, %c0_54] : memref<8x1xf32, #tpu.memory_space<vmem>>, vector<8x1xf32>
      tpu.vector_store %arg14[%c0_53, %c0_54], %86 {strides = array<i32>} : memref<8x1xf32, #tpu.memory_space<vmem>>, vector<8x1xf32>,
      %cst_55 = arith.constant 0.000000e+00 : f32
      %88 = vector.broadcast %cst_55 : f32 to vector<8x1xf32>
      %c0_56 = arith.constant 0 : index
      %c0_57 = arith.constant 0 : index
      %89 = vector.load %arg15[%c0_56, %c0_57] : memref<8x1xf32, #tpu.memory_space<vmem>>, vector<8x1xf32>
      tpu.vector_store %arg15[%c0_56, %c0_57], %88 {strides = array<i32>} : memref<8x1xf32, #tpu.memory_space<vmem>>, vector<8x1xf32>,
    } else {
    }
    %c0 = arith.constant 0 : index
    %c0_1 = arith.constant 0 : index
    %3 = vector.load %arg12[%c0, %c0_1] : memref<8x32xf32, #tpu.memory_space<vmem>>, vector<8x32xf32>
    %c0_2 = arith.constant 0 : index
    %c0_3 = arith.constant 0 : index
    %4 = vector.load %arg7[%c0_2, %c0_3] : memref<32x128xf32, #tpu.memory_space<vmem>>, vector<32x128xf32>
    %cst = arith.constant dense<0.000000e+00> : vector<8x128xf32>
    %5 = tpu.matmul %3, %4, %cst {dimension_numbers = #tpu.dot_dimension_numbers<[1], [0], [0], [1], [0, 0, 1, 1], [], []>} : vector<8x32xf32>, vector<32x128xf32>, vector<8x128xf32> -> vector<8x128xf32>
    %c0_4 = arith.constant 0 : index
    %c0_5 = arith.constant 0 : index
    %6 = vector.load %arg8[%c0_4, %c0_5] : memref<1x128xf32, #tpu.memory_space<vmem>>, vector<1x128xf32>
    %7 = vector.broadcast %6 : vector<1x128xf32> to vector<8x128xf32>
    %8 = arith.addf %5, %7 : vector<8x128xf32>
    %c0_6 = arith.constant 0 : index
    %c0_7 = arith.constant 0 : index
    %9 = vector.load %arg10[%c0_6, %c0_7] : memref<8x128xf32, #tpu.memory_space<vmem>>, vector<8x128xf32>
    tpu.vector_store %arg10[%c0_6, %c0_7], %8 {strides = array<i32>} : memref<8x128xf32, #tpu.memory_space<vmem>>, vector<8x128xf32>,
    %c0_8 = arith.constant 0 : index
    %c0_9 = arith.constant 0 : index
    %10 = vector.load %arg9[%c0_8, %c0_9] : memref<8x1xi32, #tpu.memory_space<vmem>>, vector<8x1xi32>
    %cst_10 = arith.constant dense<0xFF800000> : vector<8xf32>
    %11 = vector.multi_reduction <maximumf>, %8, %cst_10 [1] : vector<8x128xf32> to vector<8xf32>
    %12 = vector.shape_cast %11 : vector<8xf32> to vector<8x1xf32>
    %c0_11 = arith.constant 0 : index
    %c0_12 = arith.constant 0 : index
    %13 = vector.load %arg13[%c0_11, %c0_12] : memref<8x1xf32, #tpu.memory_space<vmem>>, vector<8x1xf32>
    %14 = arith.maximumf %13, %12 : vector<8x1xf32>
    %c0_13 = arith.constant 0 : index
    %c0_14 = arith.constant 0 : index
    %15 = vector.load %arg13[%c0_13, %c0_14] : memref<8x1xf32, #tpu.memory_space<vmem>>, vector<8x1xf32>
    %16 = arith.subf %15, %14 : vector<8x1xf32>
    %17 = math.exp %16 : vector<8x1xf32>
    %c0_15 = arith.constant 0 : index
    %c0_16 = arith.constant 0 : index
    %18 = vector.load %arg14[%c0_15, %c0_16] : memref<8x1xf32, #tpu.memory_space<vmem>>, vector<8x1xf32>
    %19 = arith.mulf %18, %17 : vector<8x1xf32>
    %20 = vector.broadcast %14 : vector<8x1xf32> to vector<8x128xf32>
    %21 = arith.subf %8, %20 : vector<8x128xf32>
    %22 = math.exp %21 : vector<8x128xf32>
    %cst_17 = arith.constant dense<0.000000e+00> : vector<8xf32>
    %23 = vector.multi_reduction <add>, %22, %cst_17 [1] : vector<8x128xf32> to vector<8xf32>
    %24 = vector.shape_cast %23 : vector<8xf32> to vector<8x1xf32>
    %25 = arith.addf %19, %24 : vector<8x1xf32>
    %c0_18 = arith.constant 0 : index
    %c0_19 = arith.constant 0 : index
    %26 = vector.load %arg14[%c0_18, %c0_19] : memref<8x1xf32, #tpu.memory_space<vmem>>, vector<8x1xf32>
    tpu.vector_store %arg14[%c0_18, %c0_19], %25 {strides = array<i32>} : memref<8x1xf32, #tpu.memory_space<vmem>>, vector<8x1xf32>,
    %c0_20 = arith.constant 0 : index
    %c0_21 = arith.constant 0 : index
    %27 = vector.load %arg13[%c0_20, %c0_21] : memref<8x1xf32, #tpu.memory_space<vmem>>, vector<8x1xf32>
    tpu.vector_store %arg13[%c0_20, %c0_21], %14 {strides = array<i32>} : memref<8x1xf32, #tpu.memory_space<vmem>>, vector<8x1xf32>,
    %28 = tpu.iota {dimensions = array<i32: 1>} : vector<8x128xi32>
    %c128_i32 = arith.constant 128 : i32
    %29 = arith.muli %arg1, %c128_i32 : i32
    %30 = vector.broadcast %29 : i32 to vector<8x128xi32>
    %31 = arith.addi %28, %30 : vector<8x128xi32>
    %32 = vector.broadcast %10 : vector<8x1xi32> to vector<8x128xi32>
    %33 = arith.cmpi eq, %31, %32 : vector<8x128xi32>
    %34 = arith.extui %33 : vector<8x128xi1> to vector<8x128xi32>
    %35 = arith.sitofp %34 : vector<8x128xi32> to vector<8x128xf32>
    %c0_22 = arith.constant 0 : index
    %c0_23 = arith.constant 0 : index
    %36 = vector.load %arg15[%c0_22, %c0_23] : memref<8x1xf32, #tpu.memory_space<vmem>>, vector<8x1xf32>
    %37 = arith.mulf %8, %35 : vector<8x128xf32>
    %cst_24 = arith.constant dense<0.000000e+00> : vector<8xf32>
    %38 = vector.multi_reduction <add>, %37, %cst_24 [1] : vector<8x128xf32> to vector<8xf32>
    %39 = vector.shape_cast %38 : vector<8xf32> to vector<8x1xf32>
    %40 = arith.addf %36, %39 : vector<8x1xf32>
    %c0_25 = arith.constant 0 : index
    %c0_26 = arith.constant 0 : index
    %41 = vector.load %arg15[%c0_25, %c0_26] : memref<8x1xf32, #tpu.memory_space<vmem>>, vector<8x1xf32>
    tpu.vector_store %arg15[%c0_25, %c0_26], %40 {strides = array<i32>} : memref<8x1xf32, #tpu.memory_space<vmem>>, vector<8x1xf32>,
    %c1_i32 = arith.constant 1 : i32
    %42 = arith.cmpi eq, %arg1, %c1_i32 : i32
    %43 = arith.extui %42 : i1 to i32
    %c0_i32_27 = arith.constant 0 : i32
    %44 = arith.cmpi ne, %43, %c0_i32_27 : i32
    scf.if %44 {
      %c0_28 = arith.constant 0 : index
      %c0_29 = arith.constant 0 : index
      %45 = vector.load %arg13[%c0_28, %c0_29] : memref<8x1xf32, #tpu.memory_space<vmem>>, vector<8x1xf32>
      %c0_30 = arith.constant 0 : index
      %c0_31 = arith.constant 0 : index
      %46 = vector.load %arg14[%c0_30, %c0_31] : memref<8x1xf32, #tpu.memory_space<vmem>>, vector<8x1xf32>
      %47 = math.log %46 : vector<8x1xf32>
      %48 = arith.addf %45, %47 : vector<8x1xf32>
      %c0_32 = arith.constant 0 : index
      %c0_33 = arith.constant 0 : index
      %49 = vector.load %arg9[%c0_32, %c0_33] : memref<8x1xi32, #tpu.memory_space<vmem>>, vector<8x1xi32>
      %c-100_i32 = arith.constant -100 : i32
      %50 = vector.broadcast %c-100_i32 : i32 to vector<8x1xi32>
      %51 = arith.cmpi ne, %49, %50 : vector<8x1xi32>
      %52 = arith.extui %51 : vector<8x1xi1> to vector<8x1xi32>
      %53 = arith.sitofp %52 : vector<8x1xi32> to vector<8x1xf32>
      %c0_34 = arith.constant 0 : index
      %c0_35 = arith.constant 0 : index
      %54 = vector.load %arg15[%c0_34, %c0_35] : memref<8x1xf32, #tpu.memory_space<vmem>>, vector<8x1xf32>
      %55 = arith.subf %48, %54 : vector<8x1xf32>
      %56 = arith.mulf %55, %53 : vector<8x1xf32>
      %c0_36 = arith.constant 0 : index
      %c0_37 = arith.constant 0 : index
      %57 = vector.load %arg11[%c0_36, %c0_37] : memref<8x1xf32, #tpu.memory_space<vmem>>, vector<8x1xf32>
      tpu.vector_store %arg11[%c0_36, %c0_37], %56 {strides = array<i32>} : memref<8x1xf32, #tpu.memory_space<vmem>>, vector<8x1xf32>,
    } else {
    }
    return
  }
  func.func @transform_0(%arg0: i32, %arg1: i32) -> (i32, i32) {
    %c0_i32 = arith.constant 0 : i32
    %c0_i32_0 = arith.constant 0 : i32
    return %arg0, %c0_i32 : i32, i32
  }
  func.func @transform_1(%arg0: i32, %arg1: i32) -> (i32, i32) {
    %c0_i32 = arith.constant 0 : i32
    %c0_i32_0 = arith.constant 0 : i32
    %c0_i32_1 = arith.constant 0 : i32
    return %c0_i32, %c0_i32_0 : i32, i32
  }
  func.func @transform_2(%arg0: i32, %arg1: i32) -> (i32, i32) {
    %c0_i32 = arith.constant 0 : i32
    %c0_i32_0 = arith.constant 0 : i32
    %c0_i32_1 = arith.constant 0 : i32
    return %c0_i32, %c0_i32_0 : i32, i32
  }
  func.func @transform_3(%arg0: i32, %arg1: i32) -> (i32, i32) {
    %c0_i32 = arith.constant 0 : i32
    %c0_i32_0 = arith.constant 0 : i32
    %c0_i32_1 = arith.constant 0 : i32
    return %c0_i32, %c0_i32_0 : i32, i32
  }
  func.func @transform_4(%arg0: i32, %arg1: i32) -> (i32, i32) {
    %c0_i32 = arith.constant 0 : i32
    %c0_i32_0 = arith.constant 0 : i32
    %c0_i32_1 = arith.constant 0 : i32
    return %c0_i32, %c0_i32_0 : i32, i32
  }
  func.func @transform_5(%arg0: i32, %arg1: i32) -> (i32, i32) {
    %c0_i32 = arith.constant 0 : i32
    %c0_i32_0 = arith.constant 0 : i32
    return %c0_i32, %arg1 : i32, i32
  }
  func.func @transform_6(%arg0: i32, %arg1: i32) -> (i32, i32) {
    %c0_i32 = arith.constant 0 : i32
    %c0_i32_0 = arith.constant 0 : i32
    return %c0_i32, %arg1 : i32, i32
  }
  func.func @transform_7(%arg0: i32, %arg1: i32) -> (i32, i32) {
    %c0_i32 = arith.constant 0 : i32
    %c0_i32_0 = arith.constant 0 : i32
    return %arg0, %c0_i32 : i32, i32
  }
  func.func @transform_8(%arg0: i32, %arg1: i32) -> (i32, i32) {
    %c0_i32 = arith.constant 0 : i32
    return %arg0, %arg1 : i32, i32
  }
  func.func @transform_9(%arg0: i32, %arg1: i32) -> (i32, i32) {
    %c0_i32 = arith.constant 0 : i32
    %c0_i32_0 = arith.constant 0 : i32
    return %arg0, %c0_i32 : i32, i32
  }
}

</mosaic_0001>

<bundles_post_ra>
// kernel: tpu_custom_call.1
= control target key start
LH: loop header
LB: loop body
LE: loop exit
PB: predicated region body
PF: predicated region fallthrough
CT: control target
= control target key end

     0   :  { %s2456_s0 = inlined_call_operand.hbm [shape: f32[16,32], index: 0, kind: input, shape index: {}]   ;;  %s2457_s1 = inlined_call_operand.hbm [shape: f32[32,32], index: 1, kind: input, shape index: {}]   ;;  %s2458_s2 = inlined_call_operand.hbm [shape: f32[1,32], index: 2, kind: input, shape index: {}]   ;;  %s2459_s3 = inlined_call_operand.hbm [shape: f32[1,32], index: 3, kind: input, shape index: {}]   ;;  %s2460_s4 = inlined_call_operand.hbm [shape: f32[1,32], index: 4, kind: input, shape index: {}]   ;;  %s2461_s5 = inlined_call_operand.hbm [shape: f32[32,256], index: 5, kind: input, shape index: {}]   ;;  %s2462_s6 = inlined_call_operand.hbm [shape: f32[1,256], index: 6, kind: input, shape index: {}]   ;;  %s2463_s7 = inlined_call_operand.hbm [shape: s32[16,1], index: 7, kind: input, shape index: {}]   ;;  %s2464_s8 = inlined_call_operand.hbm [shape: f32[16,256], index: 8, kind: output, shape index: {0}]   ;;  %s2465_s9 = inlined_call_operand.hbm [shape: f32[16,1], index: 9, kind: output, shape index: {1}]  }
   0x1   :  { %2504 = sst [smem:[#allocation43_spill]] %s2456_s0 }
   0x2   :  { %2505 = sst [smem:[#allocation44_spill]] %s2457_s1 }
   0x3   :  { %2506 = sst [smem:[#allocation45_spill]] %s2458_s2 }
   0x4   :  { %2507 = sst [smem:[#allocation46_spill]] %s2459_s3 }
   0x5   :  { %2508 = sst [smem:[#allocation47_spill]] %s2460_s4 }
   0x6   :  { %2509 = sst [smem:[#allocation48_spill]] %s2461_s5 }
   0x7   :  { %2510 = sst [smem:[#allocation49_spill]] %s2462_s6 }
   0x8   :  { %2511 = sst [smem:[#allocation50_spill]] %s2463_s7 }
   0x9   :  { %2512 = sst [smem:[#allocation51_spill]] %s2464_s8 }
   0xa   :  { %2513 = sst [smem:[#allocation52_spill]] %s2465_s9 }
   0xb   :  { %15 = vsyncpa [#allocation7], 0 }
   0xc   :  { %17 = vsyncpa [#allocation7 + $0x1], 0 }
   0xd   :  { %18 = vsyncpa [#allocation10], 0 }
   0xe   :  { %19 = vsyncpa [#allocation13], 0 }
   0xf   :  { %20 = vsyncpa [#allocation16], 0 }
  0x10   :  { %22 = vsyncpa [#allocation16 + $0x1], 0 }
  0x11   :  { %23 = vsyncpa [#allocation19], 0 }
  0x12   :  { %25 = vsyncpa [#allocation19 + $0x1], 0 }
  0x13   :  { %26 = vsyncpa [#allocation8], 0 }
  0x14   :  { %28 = vsyncpa [#allocation8 + $0x1], 0 }
  0x15   :  { %29 = vsyncpa [#allocation22], 0 }
  0x16   :  { %31 = vsyncpa [#allocation22 + $0x1], 0  ;;  %s1857_s30 = smov 0   ;;  %s1859_s10 = smov 0  }
  0x17   :  { %s1861_s11 = smov 0   ;;  %s1863_s12 = smov 0  }
  0x18   :  { %s1865_s13 = smov 0   ;;  %s1867_s14 = smov 0  }
  0x19   :  { %s1869_s15 = smov 0   ;;  %s1871_s16 = smov 0  }
  0x1a   :  { %s1873_s17 = smov 0   ;;  %s1875_s18 = smov 0  }
  0x1b   :  { %s1877_s19 = smov 0   ;;  %s1879_s20 = smov 0  }
  0x1c   :  { %s1881_s21 = smov 0   ;;  %s1883_s22 = smov 0  }
  0x1d LB: > { %2514 = sst [smem:[#allocation30_spill]] %s1731_s30  ;;  %s1926_s23 = sadd.s32 4294967295, %s1783_s22   ;;  %s1783_s22 = sphi %s1883_s22, %s37_s22   ;;  %s1779_s21 = sphi %s1881_s21, %s2607_s21   ;;  %s1775_s20 = sphi %s1879_s20, %s2606_s20   ;;  %s1771_s19 = sphi %s1877_s19, %s2605_s19   ;;  %s1767_s18 = sphi %s1875_s18, %s2604_s18   ;;  %s1763_s17 = sphi %s1873_s17, %s2593_s17   ;;  %s1759_s16 = sphi %s1871_s16, %s2603_s16   ;;  %s1755_s15 = sphi %s1869_s15, %s2602_s15   ;;  %s1751_s14 = sphi %s1867_s14, %s2601_s14   ;;  %s1747_s13 = sphi %s1865_s13, %s2600_s13   ;;  %s1743_s12 = sphi %s1863_s12, %s2590_s12   ;;  %s1739_s11 = sphi %s1861_s11, %s2599_s11   ;;  %s1735_s10 = sphi %s1859_s10, %s2598_s10   ;;  %s1731_s30 = sphi %s1857_s30, %s2597_s30  }
  0x1e   : > { %2515 = sst [smem:[#allocation31_spill]] %s1747_s13  ;;  %p179_p0 = scmp.ne.s32.totalorder %s1747_s13, %s1743_s12 }
  0x1f   : > { %2516 = sst [smem:[#allocation32_spill]] %s1763_s17  ;;  %p2473_p1 = scmp.eq.s32.totalorder %s1926_s23, 0 }
  0x20   : > { %2517 = sst [smem:[#allocation33_spill]] %s1767_s18  ;;  %p1061_p2 = scmp.ge.s32.totalorder %s1783_s22, 1 }
  0x21   : > { %2518 = sst [smem:[#allocation34_spill]] %s1771_s19  ;;  %p296_p3 = scmp.lt.s32.totalorder %s1783_s22, 5 }
  0x22   : > { %p1934_p4 = por %p179_p0, %p2473_p1  ;;  %s1785_s26 = smov [#allocation9]  }
  0x23   : > { %p1938_p5 = pnand %p1061_p2, %p296_p3  ;;  %s308_s27 = sshll.u32 %s1785_s26, 4  ;;  %s309_s27 = int_to_ptr.vmem [resolvable:$true] %s308_s27 }
  0x24   : > { %s2519_s24 = scalar_select %p1934_p4, 1, 0 }
  0x25   : > { %s2521_s25 = scalar_select %p1938_p5, 1, 0 }
  0x26   : > { %2520 = sst [smem:[#allocation35_spill]] %s2519_s24  ;;  %p1174_p6 = pneg %p1938_p5 }
  0x27   : > { %2522 = sst [smem:[#allocation36_spill]] %s2521_s25  ;;  %s1786_s29 = smov [#allocation12]  }
  0x28   : > { %p1946_p7 = pnand %p1174_p6, %p2473_p1  ;;  %s333_s12 = sshll.u32 %s1786_s29, 4  ;;  %s1950_s12 = int_to_ptr.vmem [resolvable:$true] %s333_s12 }
  0x29   : > { %s2524_s1 = sld [smem:[#allocation44_spill]] }
  0x2a   : > { %s2523_s28 = scalar_select %p1946_p7, 1, 0 }
  0x2b   : > { %p1960_p9 = pneg %p1946_p7 }
  0x2f   : > { %s1357_s19 = scalar_lea.hbm %s2524_s1, 512 }
  0x30   : > { %p1358_p8 = scmp.ne.s32.totalorder %s2524_s1, %s1357_s19  ;;  %p1364_p12 = scmp.lt.u32.totalorder %s1357_s19, %s2524_s1 }
  0x32   : > { %p1360_p10 = pnand %p1960_p9, %p1358_p8 }
  0x34   : > { %p1361_p11 = pneg %p1360_p10 }
  0x36   : > { %p1366_p13 = pnand %p1364_p12, %p1361_p11 }
  0x38   : > { %1369 = shalt.err (!%p1366_p13)
}
  0x39   : > { %s1370_s8 = scalar_lea.vmem %s309_s27, 512  ;;  %p1378_p6 = scmp.lt.s32.totalorder %s309_s27, %s309_s27 }
  0x3a   : > { %p1371_p0 = scmp.ne.s32.totalorder %s309_s27, %s1370_s8  ;;  %p1379_p1 = scmp.lt.s32.totalorder %s1370_s8, %s1370_s8 }
  0x3c   : > { %p1373_p2 = pnand %p1371_p0, %p1960_p9  ;;  %p1380_p4 = por %p1379_p1, %p1378_p6 }
  0x3e   : > { %p1374_p3 = pneg %p1373_p2 }
  0x40   : > { %p1381_p5 = pnand %p1380_p4, %p1374_p3 }
  0x42   : > { %1384 = shalt.err (!%p1381_p5)
}
  0x43   : > { %s1787_s9 = smov 128   ;;  %s1788_s18 = smov 8  }
  0x44   : > { %1177 = dma.hbm_to_vmem [thread:$0]  (!%p1946_p7), %s2524_s1, 512, %s309_s27, [#allocation10], %s1787_s9, %s1787_s9, %s1788_s18  }
  0x45   : > { %s2526_s3 = sld [smem:[#allocation46_spill]] }
  0x4b   : > { %s1385_s7 = scalar_lea.hbm %s2526_s3, 16 }
  0x4c   : > { %p1386_p1 = scmp.ne.s32.totalorder %s2526_s3, %s1385_s7  ;;  %p1392_p8 = scmp.lt.u32.totalorder %s1385_s7, %s2526_s3 }
  0x4e   : > { %p1388_p4 = pnand %p1386_p1, %p1960_p9 }
  0x50   : > { %p1389_p5 = pneg %p1388_p4 }
  0x52   : > { %p1394_p10 = pnand %p1392_p8, %p1389_p5 }
  0x54   : > { %1397 = shalt.err (!%p1394_p10)
}
  0x55   : > { %s1398_s27 = scalar_lea.vmem %s1950_s12, 16  ;;  %s1405_s6 = scalar_lea.vmem %s1950_s12, 32 }
  0x56   : > { %p1399_p11 = scmp.ne.s32.totalorder %s1950_s12, %s1398_s27  ;;  %p1406_p0 = scmp.lt.s32.totalorder %s1950_s12, %s1950_s12 }
  0x57   : > { %p1407_p2 = scmp.lt.s32.totalorder %s1405_s6, %s1398_s27 }
  0x58   : > { %p1401_p12 = pnand %p1399_p11, %p1960_p9 }
  0x59   : > { %p1408_p3 = por %p1407_p2, %p1406_p0 }
  0x5a   : > { %p1402_p13 = pneg %p1401_p12 }
  0x5c   : > { %p1409_p6 = pnand %p1408_p3, %p1402_p13 }
  0x5e   : > { %1412 = shalt.err (!%p1409_p6)
}
  0x5f   : > { %1183 = dma.hbm_to_vmem [thread:$0]  (!%p1946_p7), %s2526_s3, 16, %s1950_s12, [#allocation13]  }
  0x60   : > { %p2481_p1 = scmp.eq.s32.totalorder %s1783_s22, 0  ;;  %p173_p4 = scmp.ne.s32.totalorder %s1751_s14, %s1747_s13 }
  0x61   : > { %p2480_p5 = scmp.lt.s32.totalorder %s1783_s22, 4  ;;  %s373_s19 = sand.u32 1, %s1783_s22  }
  0x62   : > { %s2479_s24 = sand.u32 1, %s1751_s14   ;;  %p175_p8 = por %p173_p4, %p2481_p1 }
  0x63   : > { %s1069_s25 = sshll.u32 %s2479_s24, 5  ;;  %s1070_s29 = sshll.u32 %s1775_s20, 7 }
  0x64   : > { %s2527_s5 = sld [smem:[#allocation48_spill]]  ;;  %s377_s12 = scalar_lea.vmem [#allocation15], %s1069_s25 }
  0x65   : > { %s383_s0 = sshll.u32 %s377_s12, 4  ;;  %p2022_p10 = pnand %p2480_p5, %p175_p8  ;;  %s2026_s0 = int_to_ptr.vmem [resolvable:$true] %s383_s0 }
  0x66   : > { %s2028_s24 = scalar_lea.sflag [#allocation16], %s373_s19 }
  0x67   : > { %s2528_s7 = scalar_select %p2022_p10, 1, 0 }
  0x68   : > { %p2487_p12 = pneg %p2022_p10 }
  0x69   : > { %2529 = sst [smem:[#allocation37_spill]] %s2528_s7 }
  0x6a   : > { %s2018_s6 = scalar_lea.hbm %s2527_s5, %s1070_s29  ;;  %s1418_s27 = scalar_lea.hbm %s2527_s5, 1024 }
  0x6b   : > { %s1413_s8 = scalar_lea.hbm %s2018_s6, 512  ;;  %p1419_p2 = scmp.lt.u32.totalorder %s2018_s6, %s2527_s5 }
  0x6c   : > { %p1414_p11 = scmp.ne.s32.totalorder %s2018_s6, %s1413_s8  ;;  %p1420_p3 = scmp.lt.u32.totalorder %s1418_s27, %s1413_s8 }
  0x6d   : > { %p1422_p4 = scmp.lt.u32.totalorder %s1413_s8, %s2018_s6 }
  0x6e   : > { %p1416_p13 = pnand %p2487_p12, %p1414_p11  ;;  %p1421_p6 = por %p1420_p3, %p1419_p2 }
  0x70   : > { %p1417_p0 = pneg %p1416_p13  ;;  %p1423_p8 = por %p1422_p4, %p1421_p6 }
  0x72   : > { %p1424_p5 = pnand %p1423_p8, %p1417_p0 }
  0x74   : > { %1427 = shalt.err (!%p1424_p5)
}
  0x75   : > { %s1428_s19 = scalar_lea.vmem %s2026_s0, 512  ;;  %s1789_s25 = smov [#allocation15]  }
  0x76   : > { %p1429_p11 = scmp.ne.s32.totalorder %s2026_s0, %s1428_s19  ;;  %s1433_s29 = sshll.u32 %s1789_s25, 4  ;;  %s1434_s29 = int_to_ptr.vmem [resolvable:$false] %s1433_s29 }
  0x77   : > { %s1435_s30 = scalar_lea.vmem %s1434_s29, 1024  ;;  %p1436_p7 = scmp.lt.s32.totalorder %s2026_s0, %s1434_s29 }
  0x78   : > { %p1431_p13 = pnand %p1429_p11, %p2487_p12  ;;  %p1437_p2 = scmp.lt.s32.totalorder %s1435_s30, %s1428_s19 }
  0x7a   : > { %p1432_p1 = pneg %p1431_p13  ;;  %p1438_p3 = por %p1437_p2, %p1436_p7 }
  0x7c   : > { %p1439_p6 = pnand %p1438_p3, %p1432_p1 }
  0x7e   : > { %1442 = shalt.err (!%p1439_p6)
}
  0x7f   : > { %s1790_s8 = smov 256   ;;  %s1791_s27 = smov [#allocation11]  }
  0x80   : > { %1193 = dma.hbm_to_vmem [thread:$0]  (!%p2022_p10), %s2018_s6, 512, %s2026_s0, %s2028_s24, %s1790_s8, %s1787_s9, %s1788_s18  }
  0x81   : > { %s322_s12 = sshll.u32 %s1791_s27, 4  ;;  %s1792_s25 = smov [#allocation14]   ;;  %s323_s12 = int_to_ptr.vmem [resolvable:$true] %s322_s12 }
  0x82   : > { %s344_s1 = sshll.u32 %s1792_s25, 4  ;;  %s2530_s2 = sld [smem:[#allocation45_spill]]  ;;  %s345_s1 = int_to_ptr.vmem [resolvable:$true] %s344_s1 }
  0x88   : > { %s1443_s30 = scalar_lea.hbm %s2530_s2, 16 }
  0x89   : > { %p1444_p7 = scmp.ne.s32.totalorder %s2530_s2, %s1443_s30  ;;  %p1450_p0 = scmp.lt.u32.totalorder %s1443_s30, %s2530_s2 }
  0x8b   : > { %p1446_p1 = pnand %p1444_p7, %p1960_p9 }
  0x8d   : > { %p1447_p5 = pneg %p1446_p1 }
  0x8f   : > { %p1452_p4 = pnand %p1450_p0, %p1447_p5 }
  0x91   : > { %1455 = shalt.err (!%p1452_p4)
}
  0x92   : > { %s1456_s9 = scalar_lea.vmem %s323_s12, 16  ;;  %s1463_s18 = scalar_lea.vmem %s323_s12, 32 }
  0x93   : > { %p1457_p8 = scmp.ne.s32.totalorder %s323_s12, %s1456_s9  ;;  %p1464_p2 = scmp.lt.s32.totalorder %s323_s12, %s323_s12 }
  0x94   : > { %p1465_p3 = scmp.lt.s32.totalorder %s1463_s18, %s1456_s9 }
  0x95   : > { %p1459_p11 = pnand %p1457_p8, %p1960_p9 }
  0x96   : > { %p1466_p6 = por %p1465_p3, %p1464_p2 }
  0x97   : > { %p1460_p13 = pneg %p1459_p11 }
  0x99   : > { %p1467_p12 = pnand %p1466_p6, %p1460_p13 }
  0x9b   : > { %1470 = shalt.err (!%p1467_p12)
}
  0x9c   : > { %p2531_p7 = scmp.ne.s32.totalorder %s2523_s28, 0  ;;  %s2532_s4 = sld [smem:[#allocation47_spill]] }
  0x9e   : > { %1180 = dma.hbm_to_vmem [thread:$0]  (!%p2531_p7), %s2530_s2, 16, %s323_s12, [#allocation10]  }
  0xa2   : > { %s1471_s0 = scalar_lea.hbm %s2532_s4, 16 }
  0xa3   : > { %p1472_p1 = scmp.ne.s32.totalorder %s2532_s4, %s1471_s0  ;;  %p1478_p12 = scmp.lt.u32.totalorder %s1471_s0, %s2532_s4 }
  0xa5   : > { %p1474_p5 = pnand %p1472_p1, %p1960_p9 }
  0xa7   : > { %p1475_p0 = pneg %p1474_p5 }
  0xa9   : > { %p1480_p4 = pnand %p1478_p12, %p1475_p0 }
  0xab   : > { %1483 = shalt.err (!%p1480_p4)
}
  0xac   : > { %s1484_s29 = scalar_lea.vmem %s345_s1, 16  ;;  %s1491_s12 = scalar_lea.vmem %s345_s1, 32 }
  0xad   : > { %p1485_p8 = scmp.ne.s32.totalorder %s345_s1, %s1484_s29  ;;  %p1492_p2 = scmp.lt.s32.totalorder %s345_s1, %s345_s1 }
  0xae   : > { %p1493_p3 = scmp.lt.s32.totalorder %s1491_s12, %s1484_s29 }
  0xaf   : > { %p1487_p11 = pnand %p1485_p8, %p1960_p9 }
  0xb0   : > { %p1494_p6 = por %p1493_p3, %p1492_p2 }
  0xb1   : > { %p1488_p13 = pneg %p1487_p11 }
  0xb3   : > { %p1495_p10 = pnand %p1494_p6, %p1488_p13 }
  0xb5   : > { %1498 = shalt.err (!%p1495_p10)
}
  0xb6   : > { %1186 = dma.hbm_to_vmem [thread:$0]  (!%p2531_p7), %s2532_s4, 16, %s345_s1, [#allocation13]  }
  0xb7   : > { %s1060_s28 = sadd.s32 4294967294, %s1783_s22   ;;  %s46_s26 = sadd.s32 1, %s1775_s20 }
  0xb8   : > { %s49_s9 = sadd.s32 1, %s1779_s21  ;;  %p47_p9 = scmp.ge.s32.totalorder %s46_s26, 2 }
  0xb9   : > { %s56_s18 = sadd.s32 1, %s1763_s17  ;;  %p63_p10 = scmp.ne.s32.totalorder %s1763_s17, %s1759_s16 }
  0xba   : > { %p69_p1 = scmp.ne.s32.totalorder %s1759_s16, %s1755_s15  ;;  %s2609_s26 = smov (%p47_p9, %s46_s26), 0 }
  0xbb   : > { %2533 = sst [smem:[#allocation38_spill]] %s2609_s26  ;;  %s2611_s9 = smov (!%p47_p9, %s49_s9), %s1779_s21 }
  0xbc   : > { %p2534_p7 = scmp.eq.s32.totalorder %s1783_s22, 0  ;;  %p2536_p0 = scmp.eq.s32.totalorder %s1926_s23, 0 }
  0xbd   : > { %s2538_s5 = sld [smem:[#allocation30_spill]]  ;;  %p51_p4 = scmp.ge.s32.totalorder %s2611_s9, 2 }
  0xbe   : > { %p2110_p5 = por %p2534_p7, %p63_p10  ;;  %p2119_p12 = por %p2536_p0, %p69_p1 }
  0xbf   : > { %s163_s13 = ssub.s32 %s1775_s20, %s2609_s26  ;;  %s246_s6 = sadd.s32 1, %s1739_s11 }
  0xc0   : > { %s2537_s3 = scalar_select %p2119_p12, 1, 0 }
  0xc1   : > { %p164_p8 = scmp.eq.s32.totalorder %s163_s13, 0  ;;  %s2613_s9 = smov (%p51_p4, %s2611_s9), 0 }
  0xc2   : > { %2539 = sst [smem:[#allocation39_spill]] %s2613_s9  ;;  %s2540_s0 = sadd.s32 1, %s1751_s14 }
  0xc3   : > { %s2131_s7 = scalar_select %p164_p8, %s1751_s14, %s2540_s0  }
  0xc4   : > { %s53_s8 = ssub.s32 %s1779_s21, %s2613_s9  ;;  %p256_p11 = scmp.ne.s32.totalorder %s1739_s11, %s1735_s10 }
  0xc5   : > { %2541 = sst [smem:[#allocation40_spill]] %s2131_s7  ;;  %p54_p13 = scmp.eq.s32.totalorder %s53_s8, 0 }
  0xc6   : > { %s243_s27 = sor.u32 %s163_s13, %s53_s8  ;;  %p257_p3 = scmp.eq.s32.totalorder %s1926_s23, 3 }
  0xc7   : > { %p244_p2 = scmp.eq.s32.totalorder %s243_s27, 0  ;;  %p262_p9 = scmp.ne.s32.totalorder %s1735_s10, %s2538_s5 }
  0xc8   : > { %s2139_s25 = scalar_select %p54_p13, %s1763_s17, %s56_s18  }
  0xc9   : > { %s2142_s29 = scalar_select %p244_p2, %s1739_s11, %s246_s6  }
  0xca   : > { %2542 = sst [smem:[#allocation41_spill]] %s2139_s25  ;;  %p2144_p6 = por %p257_p3, %p256_p11 }
  0xcb   : > { %2543 = sst [smem:[#allocation42_spill]] %s2142_s29  ;;  %p263_p7 = scmp.eq.s32.totalorder %s1060_s28, 3 }
  0xcc   : > { %s2544_s12 = scalar_select %p2144_p6, 1, 0 }
  0xcd   : > { %p2153_p0 = por %p257_p3, %p63_p10  ;;  %s2158_s30 = sand.u32 1, %s1763_s17  }
  0xce   : > { %s2491_s18 = sshll.u32 %s1779_s21, 7  ;;  %p2161_p4 = por %p263_p7, %p262_p9 }
  0xcf   : > { %s2545_s19 = scalar_select %p2153_p0, 1, 0 }
  0xd0   : > { %s2546_s13 = scalar_select %p2161_p4, 1, 0 }
  0xd1   : > { %p2168_p8 = por %p263_p7, %p69_p1  ;;  %s2492_s28 = sshll.u32 %s2158_s30, 3 }
  0xd2   : > { %s2548_s8 = sld [smem:[#allocation43_spill]]  ;;  %s359_s2 = scalar_lea.vmem [#allocation6], %s2492_s28 }
  0xd3   : > { %s2547_s6 = scalar_select %p2168_p8, 1, 0 }
  0xd4   : > { %s366_s4 = sshll.u32 %s359_s2, 4  ;;  %p2549_p10 = scmp.lt.s32.totalorder %s1783_s22, 4  ;;  %s2190_s4 = int_to_ptr.vmem [resolvable:$true] %s366_s4 }
  0xd5   : > { %s356_s0 = scalar_lea.sflag [#allocation7], %s2158_s30 }
  0xd6   : > { %p2186_p1 = pnand %p2549_p10, %p2110_p5 }
  0xd8   : > { %s2178_s27 = scalar_lea.hbm %s2548_s8, %s2491_s18  ;;  %p2498_p13 = pneg %p2186_p1 }
  0xd9   : > { %s2550_s9 = scalar_select %p2186_p1, 1, 0 }
  0xda   : > { %s1499_s18 = scalar_lea.hbm %s2178_s27, 128  ;;  %s1504_s28 = scalar_lea.hbm %s2548_s8, 256 }
  0xdb   : > { %p1500_p11 = scmp.ne.s32.totalorder %s2178_s27, %s1499_s18  ;;  %p1505_p5 = scmp.lt.u32.totalorder %s2178_s27, %s2548_s8 }
  0xdc   : > { %p1506_p9 = scmp.lt.u32.totalorder %s1504_s28, %s1499_s18  ;;  %p1508_p10 = scmp.lt.u32.totalorder %s1499_s18, %s2178_s27 }
  0xdd   : > { %p1502_p2 = pnand %p2498_p13, %p1500_p11 }
  0xde   : > { %p1507_p7 = por %p1506_p9, %p1505_p5 }
  0xdf   : > { %p1503_p3 = pneg %p1502_p2 }
  0xe0   : > { %p1509_p8 = por %p1508_p10, %p1507_p7 }
  0xe2   : > { %p1510_p4 = pnand %p1509_p8, %p1503_p3 }
  0xe4   : > { %1513 = shalt.err (!%p1510_p4)
}
  0xe5   : > { %s1514_s5 = scalar_lea.vmem %s2190_s4, 128  ;;  %s1793_s2 = smov [#allocation6]  }
  0xe6   : > { %p1515_p11 = scmp.ne.s32.totalorder %s2190_s4, %s1514_s5  ;;  %s1519_s1 = sshll.u32 %s1793_s2, 4  ;;  %s1520_s1 = int_to_ptr.vmem [resolvable:$false] %s1519_s1 }
  0xe7   : > { %s1521_s26 = scalar_lea.vmem %s1520_s1, 256  ;;  %p1522_p6 = scmp.lt.s32.totalorder %s2190_s4, %s1520_s1 }
  0xe8   : > { %p1517_p2 = pnand %p1515_p11, %p2498_p13  ;;  %p1523_p5 = scmp.lt.s32.totalorder %s1521_s26, %s1514_s5 }
  0xea   : > { %p1518_p0 = pneg %p1517_p2  ;;  %p1524_p9 = por %p1523_p5, %p1522_p6 }
  0xec   : > { %p1525_p7 = pnand %p1524_p9, %p1518_p0 }
  0xee   : > { %1528 = shalt.err (!%p1525_p7)
}
  0xef   : > { %s2551_s25 = sld [smem:[#allocation37_spill]]  ;;  %s2552_s18 = sshll.u32 %s1775_s20, 4 }
  0xf0   : > { %1190 = dma.hbm_to_vmem [thread:$0]  (!%p2186_p1), %s2178_s27, 128, %s2190_s4, %s356_s0  }
  0xf1   : > { %s2553_s17 = sld [smem:[#allocation49_spill]]  ;;  %s2555_s29 = sand.u32 1, %s1751_s14  }
  0xf2   : > { %s396_s5 = scalar_lea.vmem [#allocation17], %s2555_s29 }
  0xf3   : > { %s403_s1 = sshll.u32 %s396_s5, 4  ;;  %s404_s1 = int_to_ptr.vmem [resolvable:$true] %s403_s1 }
  0xf5   : > { %p2556_p0 = scmp.ne.s32.totalorder %s2551_s25, 0 }
  0xf7   : > { %s2554_s7 = smov %s2553_s17  ;;  %s2224_s2 = scalar_lea.hbm %s2553_s17, %s2552_s18 }
  0xf8   : > { %s1529_s26 = scalar_lea.hbm %s2224_s2, 16  ;;  %p2557_p4 = pneg %p2556_p0 }
  0xf9   : > { %p1530_p6 = scmp.ne.s32.totalorder %s2224_s2, %s1529_s26  ;;  %s1534_s8 = scalar_lea.hbm %s2554_s7, 32 }
  0xfa   : > { %p1535_p10 = scmp.lt.u32.totalorder %s2224_s2, %s2554_s7  ;;  %p1536_p11 = scmp.lt.u32.totalorder %s1534_s8, %s1529_s26 }
  0xfb   : > { %p1532_p8 = pnand %p1530_p6, %p2557_p4  ;;  %p1538_p5 = scmp.lt.u32.totalorder %s1529_s26, %s2224_s2 }
  0xfc   : > { %p1537_p2 = por %p1536_p11, %p1535_p10 }
  0xfd   : > { %p1533_p3 = pneg %p1532_p8 }
  0xfe   : > { %p1539_p9 = por %p1538_p5, %p1537_p2 }
 0x100   : > { %p1540_p7 = pnand %p1539_p9, %p1533_p3 }
 0x102   : > { %1543 = shalt.err (!%p1540_p7)
}
 0x103   : > { %s1544_s29 = scalar_lea.vmem %s404_s1, 16  ;;  %p2558_p6 = pmov %p2557_p4 }
 0x104   : > { %p1545_p13 = scmp.ne.s32.totalorder %s404_s1, %s1544_s29  ;;  %s1794_s18 = smov [#allocation17]  }
 0x105   : > { %s1549_s28 = sshll.u32 %s1794_s18, 4  ;;  %s1550_s28 = int_to_ptr.vmem [resolvable:$false] %s1549_s28 }
 0x106   : > { %p1547_p4 = pnand %p1545_p13, %p2558_p6  ;;  %s1551_s5 = scalar_lea.vmem %s1550_s28, 32 }
 0x107   : > { %p1552_p12 = scmp.lt.s32.totalorder %s404_s1, %s1550_s28  ;;  %p1553_p1 = scmp.lt.s32.totalorder %s1551_s5, %s1544_s29 }
 0x108   : > { %p1548_p8 = pneg %p1547_p4 }
 0x109   : > { %p1554_p10 = por %p1553_p1, %p1552_p12 }
 0x10b   : > { %p1555_p11 = pnand %p1554_p10, %p1548_p8 }
 0x10d   : > { %1558 = shalt.err (!%p1555_p11)
}
 0x10e   : > { %1196 = dma.hbm_to_vmem [thread:$0]  (!%p2556_p0), %s2224_s2, 16, %s404_s1, %s2028_s24  }
 0x10f   : > { %s2559_s26 = sshll.u32 %s1779_s21, 7  ;;  %s2560_s8 = sld [smem:[#allocation50_spill]] }
 0x110   : > { %s2561_s0 = sshll.u32 %s2158_s30, 3  ;;  %s411_s18 = scalar_lea.sflag [#allocation19], %s2158_s30 }
 0x111   : > { %s414_s29 = scalar_lea.vmem [#allocation18], %s2561_s0  ;;  %p2562_p1 = scmp.ne.s32.totalorder %s2550_s9, 0 }
 0x112   : > { %s421_s25 = sshll.u32 %s414_s29, 4  ;;  %s422_s25 = int_to_ptr.vmem [resolvable:$true] %s421_s25 }
 0x113   : > { %p2563_p13 = pneg %p2562_p1 }
 0x115   : > { %s2253_s17 = scalar_lea.hbm %s2560_s8, %s2559_s26  ;;  %s1564_s1 = scalar_lea.hbm %s2560_s8, 256 }
 0x116   : > { %s1559_s28 = scalar_lea.hbm %s2253_s17, 128  ;;  %p1565_p2 = scmp.lt.u32.totalorder %s2253_s17, %s2560_s8 }
 0x117   : > { %p1560_p12 = scmp.ne.s32.totalorder %s2253_s17, %s1559_s28  ;;  %p1566_p5 = scmp.lt.u32.totalorder %s1564_s1, %s1559_s28 }
 0x118   : > { %p1568_p7 = scmp.lt.u32.totalorder %s1559_s28, %s2253_s17 }
 0x119   : > { %p1562_p0 = pnand %p1560_p12, %p2563_p13  ;;  %p1567_p9 = por %p1566_p5, %p1565_p2 }
 0x11b   : > { %p1563_p3 = pneg %p1562_p0  ;;  %p1569_p6 = por %p1568_p7, %p1567_p9 }
 0x11d   : > { %p1570_p4 = pnand %p1569_p6, %p1563_p3 }
 0x11f   : > { %1573 = shalt.err (!%p1570_p4)
}
 0x120   : > { %s1574_s30 = scalar_lea.vmem %s422_s25, 128  ;;  %p2564_p10 = pmov %p2563_p13 }
 0x121   : > { %p1575_p8 = scmp.ne.s32.totalorder %s422_s25, %s1574_s30  ;;  %s1795_s4 = smov [#allocation18]  }
 0x122   : > { %s1579_s27 = sshll.u32 %s1795_s4, 4  ;;  %s1580_s27 = int_to_ptr.vmem [resolvable:$false] %s1579_s27 }
 0x123   : > { %p1577_p11 = pnand %p1575_p8, %p2564_p10  ;;  %s1581_s0 = scalar_lea.vmem %s1580_s27, 256 }
 0x124   : > { %p1582_p13 = scmp.lt.s32.totalorder %s422_s25, %s1580_s27  ;;  %p1583_p0 = scmp.lt.s32.totalorder %s1581_s0, %s1574_s30 }
 0x125   : > { %p1578_p12 = pneg %p1577_p11 }
 0x126   : > { %p1584_p2 = por %p1583_p0, %p1582_p13 }
 0x128   : > { %p1585_p5 = pnand %p1584_p2, %p1578_p12 }
 0x12a   : > { %1588 = shalt.err (!%p1585_p5)
}
 0x12b   : > { %1199 = dma.hbm_to_vmem [thread:$0]  (!%p2562_p1), %s2253_s17, 128, %s422_s25, %s411_s18  }
 0x12c   : > { %s2565_s29 = sld [smem:[#allocation36_spill]] }
 0x132   : > { %p2566_p3 = scmp.ne.s32.totalorder %s2565_s29, 0 }
 0x133   : > { %s2280_s28 = sand.u32 (!%p2566_p3), 1, %s1759_s16   ;;  %p2567_p9 = scmp.ne.s32.totalorder (!%p2566_p3), %s2537_s3, 0 }
 0x134   : > { %430 = sbr.rel (%p2566_p3) target bundleno = 1496 (0x5d8), region = 52  ;;  %s2283_s24 = sshll.u32 (!%p2566_p3), %s2280_s28, 3 }
 0x135   : > { %s433_s2 = scalar_lea.sflag (!%p2566_p3), [#allocation7], %s2280_s28  ;;  %s436_s1 = scalar_lea.vmem (!%p2566_p3), [#allocation6], %s2283_s24 }
 0x13b   : > { %1702 = dma.done.wait (%p2567_p9), %s433_s2, 128  }
 0x13c   : > { %1704 = vsyncadd (%p2567_p9), %s433_s2, 4294967168  ;;  %p2568_p1 = scmp.eq.s32.totalorder %s1926_s23, 0 }
 0x13e   : > { %1706 = dma.done.wait (%p2568_p1), [#allocation10], 528   ;;  %p2569_p7 = pmov %p2568_p1 }
 0x13f   : > { %p2570_p6 = pmov %p2568_p1 }
 0x140   : > { %1708 = vsyncadd (%p2569_p7), [#allocation10], 4294966768 }
 0x141   : > { %1710 = dma.done.wait (%p2570_p6), [#allocation13], 32   ;;  %p2571_p4 = pmov %p2568_p1 }
 0x142   : > { %s2572_s9 = sld [smem:[#allocation31_spill]]  ;;  %s2573_s17 = sld [smem:[#allocation35_spill]] }
 0x143   : > { %1712 = vsyncadd (%p2571_p4), [#allocation13], 4294967264  ;;  %s457_s25 = sand.u32 1, %s1926_s23  }
 0x144   : > { %s458_s26 = scalar_lea.sflag [#allocation16], %s457_s25 }
 0x148   : > { %s459_s18 = sand.u32 1, %s2572_s9   ;;  %p2574_p8 = scmp.ne.s32.totalorder %s2573_s17, 0 }
 0x149   : > { %s1080_s5 = sshll.u32 %s459_s18, 5 }
 0x14a   : > { %s2301_s30 = scalar_lea.vmem [#allocation15], %s1080_s5 }
 0x14b   : > { %1714 = dma.done.wait (%p2574_p8), %s458_s26, 528  }
 0x14c   : > { %1716 = vsyncadd (%p2574_p8), %s458_s26, 4294966768  ;;  %s2307_s4 = scalar_lea.vmem [#allocation17], %s459_s18  ;;  %s475_s27 = scalar_lea.sflag [#allocation19], %s2280_s28 }
 0x14d   : > { %s478_s0 = scalar_lea.vmem [#allocation18], %s2283_s24 }
 0x14e   : > { %1718 = dma.done.wait (%p2567_p9), %s475_s27, 128  }
 0x14f   : > { %1720 = vsyncadd (%p2567_p9), %s475_s27, 4294967168  ;;  %s522_s23 = sand.u32 1, %s1735_s10   ;;  %s2502_s9 = scalar_lea.vmem [#allocation21], %s2283_s24 }
 0x150   : > { %s2318_s29 = sshll.u32 %s522_s23, 3  ;;  %s2575_s17 = sld [smem:[#allocation33_spill]] }
 0x151   : > { %s524_s2 = scalar_lea.vmem [#allocation20], %s2318_s29 }
 0x156   : > { %p1084_p10 = scmp.ne.s32.totalorder %s2575_s17, 0 }
 0x157   : > { %v537_v0 = vld [vmem:[#allocation9] sm:$0xff] (!%p1084_p10)  ;;  %v538_v1 = vld [vmem:[#allocation9 + $0x8] sm:$0xff] (!%p1084_p10)  ;;  %v539_v2 = vld [vmem:[#allocation9 + $0x10] sm:$0xff] (!%p1084_p10)  ;;  %v1796_v3 = vmov (!%p1084_p10), 0.0|0.0   ;;  %vm1797_vm0 = vmmov (!%p1084_p10), 0   ;;  %v1798_v6 = vmov (!%p1084_p10), 0.0  }
 0x158   : > { %535 = sbr.rel (%p1084_p10) target bundleno = 755 (0x2f3), region = 88  ;;  %1134 = vmatprep.subr.bf16.mxu0 (!%p1084_p10), %v1796_v3  ;;  %v1135_v4 = vpack.c.bf16 (!%p1084_p10), %v538_v1, %v537_v0  ;;  %v540_v5 = vld [vmem:[#allocation9 + $0x18] sm:$0xff] (!%p1084_p10)  ;;  %1120 = vmatprep.mubr.msk.f32.mxu0 (!%p1084_p10), %vm1797_vm0, %v1798_v6  ;;  %vm660_vm1 = vcmask (!%p1084_p10), 7168   ;;  %v1799_v7 = vmov (!%p1084_p10), -inf   ;;  %vm548_vm2 = vcmask (!%p1084_p10), 261120  }
 0x159   : > { %661 = vst.msk [vmem:[#allocation3] sm:$0xff] (!%p1084_p10), %vm660_vm1, %v1799_v7  ;;  %662 = vst.msk [vmem:[#allocation4] sm:$0xff] (!%p1084_p10), %vm660_vm1, %v1798_v6  ;;  %v1138_v8 = vpack.c.bf16 (!%p1084_p10), %v540_v5, %v539_v2  ;;  %v536_v9 = vld [vmem:[%s436_s1] sm:$0xff] (!%p1084_p10)  ;;  %v1085_v10 = vld [vmem:[#allocation11] ss:$0 sm:$0xff] (!%p1084_p10) }
 0x15a   : > { %663 = vst.msk [vmem:[#allocation5] sm:$0xff] (!%p1084_p10), %vm660_vm1, %v1798_v6  ;;  %1136 = vmatpush3.bf16.msra.mxu0 (!%p1084_p10), %v1135_v4  ;;  %v1087_v31 = vld [vmem:[#allocation12] ss:$0 sm:$0xff] (!%p1084_p10)  ;;  %v1088_v33 = vld [vmem:[#allocation14] ss:$0 sm:$0xff] (!%p1084_p10) }
 0x15b   : > { %1137 = vmatprep.subr.bf16.mxu0 (!%p1084_p10), %v1796_v3 }
 0x15e   : > { %1139 = vmatpush3.bf16.msra.mxu0 (!%p1084_p10), %v1138_v8 }
 0x161   : > { %1121 = vmatmul.mubr.msk.f32.vlgmr.msra.gmra.mrb[0].mxu0 %vm548_vm2, %v536_v9 }
 0x234   : > { %v618_v11 = vpop.f32.mrb[0].mxu0 }
 0x235   : > { %v619_v12 = vadd.f32 %v1085_v10, %v618_v11  ;;  %v1122_v13 = vpop.f32.mrb[1].mxu0 }
 0x237   : > { %v623_v14 = vmul.f32 0.70710677, %v619_v12  ;;  %v622_v16 = vmul.f32 0.5, %v619_v12 }
 0x239   : > { %1345 = verf.f32 %v623_v14 }
 0x243   : > { %v1346_v15 = vpop.eup %1345 }
 0x244   : > { %v625_v17 = vadd.f32 1.0, %v1346_v15 }
 0x246   : > { %v626_v18 = vmul.f32 %v625_v17, %v622_v16 }
 0x248   : > { %v627_v19 = vsel %vm548_vm2, %v626_v18, 0.0  ;;  %v632_v20 = vmul.f32 %v626_v18, %v626_v18 }
 0x249   : > { %628 = vadd.xlane.f32.xlu0 %v627_v19 }
 0x24a   : > { %v633_v21 = vsel %vm548_vm2, %v632_v20, 0.0 }
 0x24d   : > { %634 = vadd.xlane.f32.xlu0 %v633_v21 }
 0x2d6   : > { %v629_v22 = vpop.xlane.xlu0 %628 }
 0x2d7   : > { %v631_v23 = vmul.f32 0.03125, %v629_v22 }
 0x2d9   : > { %v637_v25 = vmul.f32 %v631_v23, %v631_v23  ;;  %v639_v29 = vsub.f32 %v626_v18, %v631_v23 }
 0x2da   : > { %v635_v24 = vpop.xlane.xlu0 %634 }
 0x2db   : > { %v636_v26 = vmul.f32 0.03125, %v635_v24 }
 0x2dd   : > { %v638_v27 = vsub.f32 %v636_v26, %v637_v25 }
 0x2df   : > { %v640_v28 = vadd.f32 1e-07, %v638_v27 }
 0x2e1   : > { %1347 = vrsqrt.f32 %v640_v28 }
 0x2eb   : > { %v1348_v30 = vpop.eup %1347 }
 0x2ec   : > { %v642_v32 = vmul.f32 %v1348_v30, %v639_v29 }
 0x2ee   : > { %v650_v34 = vmul.f32 %v1087_v31, %v642_v32 }
 0x2f0   : > { %v658_v35 = vadd.f32 %v1088_v33, %v650_v34 }
 0x2f2   : > { %659 = vst.msk [vmem:[#allocation2] sm:$0xff] %vm548_vm2, %v658_v35 }
 0x2f3 PF: > { %v665_v36 = vld [vmem:[%s2301_s30] sm:$0xff]  ;;  %v666_v37 = vld [vmem:[%s2301_s30 + $0x8] sm:$0xff]  ;;  %v667_v38 = vld [vmem:[%s2301_s30 + $0x10] sm:$0xff]  ;;  %v1800_v39 = vmov 0.0|0.0   ;;  %vm1801_vm3 = vmmov 0   ;;  %v1802_v42 = vmov 0.0   ;;  %v775_v55 = vlaneseq }
 0x2f4   : > { %1140 = vmatprep.subr.bf16.mxu0 %v1800_v39  ;;  %v1141_v40 = vpack.c.bf16 %v666_v37, %v665_v36  ;;  %v668_v41 = vld [vmem:[%s2301_s30 + $0x18] sm:$0xff]  ;;  %1131 = vmatprep.mubr.msk.f32.mxu0 %vm1801_vm3, %v1802_v42  ;;  %v751_v43 = vld [vmem:[%s478_s0] sm:$0xff]  ;;  %v1803_v44 = vmov 0   ;;  %vm676_vm4 = vcmask 261120   ;;  %s2576_s3 = sld [smem:[#allocation33_spill]]  ;;  %vm772_vm5 = vcmask 7168  }
 0x2f5   : > { %1350 = vset.pattern.permute.xlu1 %v1803_v44  ;;  %1349 = vset.pattern.permute.xlu0 %v1803_v44  ;;  %v1144_v45 = vpack.c.bf16 %v668_v41, %v667_v38  ;;  %v1089_v47 = vld [vmem:[%s2307_s4] ss:$0 sm:$0xff]  ;;  %v754_v51 = vld [vmem:[#allocation3] sm:$0xff]  ;;  %v776_v59 = vand.u32 127, %v775_v55  ;;  %v759_v4 = vld [vmem:[#allocation4] sm:$0xff] }
 0x2f6   : > { %1142 = vmatpush3.bf16.msra.mxu0 %v1141_v40  ;;  %781 = vperm.xlu1 %1350, %v751_v43   ;;  %v786_v8 = vld [vmem:[#allocation5] sm:$0xff] }
 0x2f7   : > { %1143 = vmatprep.subr.bf16.mxu0 %v1800_v39 }
 0x2f9   : > { %v664_v46 = vld [vmem:[#allocation2] sm:$0xff] }
 0x2fa   : > { %1145 = vmatpush3.bf16.msra.mxu0 %v1144_v45  ;;  %s1091_s1 = sshll.u32 %s2576_s3, 7  ;;  %p1093_p11 = scmp.ne.s32.totalorder %s2576_s3, 1 }
 0x2fb   : > { %v778_v60 = vstv %s1091_s1  ;;  %v801_v12 = vld [vmem:[%s478_s0] sm:$0xff] (!%p1093_p11)  ;;  %v1804_v18 = vmov (!%p1093_p11), 0.0  }
 0x2fc   : > { %v779_v61 = vadd.s32 %v778_v60, %v776_v59  ;;  %vm802_vm7 = vcmp.ne.s32.totalorder (!%p1093_p11), %v801_v12, 4294967196 }
 0x2fd   : > { %1132 = vmatmul.mubr.msk.f32.vlgmr.msra.gmra.mrb[0].mxu0 %vm676_vm4, %v664_v46  ;;  %v1094_v19 = vsel (!%p1093_p11), %vm802_vm7, 1.0, %v1804_v18 }
 0x375   : > { %v782_v62 = vpop.permute.xlu1 %781 }
 0x376   : > { %vm783_vm6 = vcmp.eq.s32.totalorder %v779_v61, %v782_v62 }
 0x377   : > { %v1092_v0 = vsel %vm783_vm6, 1.0, %v1802_v42 }
 0x3d0   : > { %v746_v48 = vpop.f32.mrb[0].mxu0 }
 0x3d1   : > { %v747_v49 = vadd.f32 %v1089_v47, %v746_v48  ;;  %v1133_v50 = vpop.f32.mrb[1].mxu0 }
 0x3d3   : > { %750 = vst [vmem:[%s524_s2] sm:$0xff] %v747_v49  ;;  %752 = vmax.xlane.f32.xlu0 %v747_v49  ;;  %v787_v1 = vmul.f32 %v1092_v0, %v747_v49 }
 0x460   : > { %v753_v52 = vpop.xlane.xlu0 %752 }
 0x461   : > { %v755_v53 = vmax.f32 %v754_v51, %v753_v52 }
 0x463   : > { %v756_v54 = vsub.f32 %v754_v51, %v755_v53  ;;  %774 = vst.msk [vmem:[#allocation3] sm:$0xff] %vm772_vm5, %v755_v53  ;;  %763 = vperm.xlu0 %1349, %v755_v53  }
 0x465   : > { %v757_v2 = vmul.f32 1.442695, %v756_v54 }
 0x46a   : > { %v796_v14 = vld [vmem:[#allocation3] sm:$0xff] (!%p1093_p11) }
 0x4e2   : > { %v764_v56 = vpop.permute.xlu0 %763 }
 0x4e3   : > { %v766_v57 = vsub.f32 %v747_v49, %v764_v56 }
 0x4e5   : > { %v767_v58 = vmul.f32 1.442695, %v766_v57 }
 0x4e7   : > { %1351 = vpow2.f32 %v767_v58 }
 0x4e8   : > { %1353 = vpow2.f32 %v757_v2 }
 0x4f1   : > { %v1352_v63 = vpop.eup %1351 }
 0x4f2   : > { %769 = vadd.xlane.f32.xlu1 %v1352_v63  ;;  %v1354_v3 = vpop.eup %1353 }
 0x4f3   : > { %v760_v5 = vmul.f32 %v1354_v3, %v759_v4 }
 0x4f6   : > { %788 = vadd.xlane.f32.xlu1 %v787_v1 }
 0x57f   : > { %v770_v6 = vpop.xlane.xlu1 %769 }
 0x580   : > { %v771_v7 = vadd.f32 %v770_v6, %v760_v5  ;;  %795 = sbr.rel (%p1093_p11) target bundleno = 1438 (0x59e), region = 92 }
 0x582   : > { %773 = vst.msk [vmem:[#allocation4] sm:$0xff] %vm772_vm5, %v771_v7 }
 0x583   : > { %v789_v9 = vpop.xlane.xlu1 %788 }
 0x584   : > { %v790_v10 = vadd.f32 %v789_v9, %v786_v8 }
 0x586   : > { %791 = vst.msk [vmem:[#allocation5] sm:$0xff] %vm772_vm5, %v790_v10 }
 0x589   : > { %v797_v11 = vld [vmem:[#allocation4] sm:$0xff] }
 0x58a   : > { %1355 = vlog2.f32 %v797_v11 }
 0x58d   : > { %v805_v16 = vld [vmem:[#allocation5] sm:$0xff] }
 0x594   : > { %v1356_v13 = vpop.eup %1355 }
 0x595   : > { %v799_v15 = vmul.f32 0.6931472, %v1356_v13 }
 0x597   : > { %v800_v17 = vadd.f32 %v799_v15, %v796_v14 }
 0x599   : > { %v806_v20 = vsub.f32 %v800_v17, %v805_v16 }
 0x59b   : > { %v807_v21 = vmul.f32 %v1094_v19, %v806_v20 }
 0x59d   : > { %808 = vst.msk [vmem:[%s2502_s9] sm:$0xff] %vm772_vm5, %v807_v21 }
 0x59e PF: > { %s2577_s25 = sld [smem:[#allocation34_spill]]  ;;  %s2578_s18 = sld [smem:[#allocation33_spill]] }
 0x59f   : > { %s830_s30 = sshll.u32 %s524_s2, 4  ;;  %s2579_s17 = sld [smem:[#allocation51_spill]]  ;;  %s2352_s30 = int_to_ptr.vmem [resolvable:$true] %s830_s30 }
 0x5a0   : > { %s810_s9 = scalar_lea.sflag [#allocation8], %s522_s23  ;;  %s1589_s7 = scalar_lea.vmem %s2352_s30, 128 }
 0x5a1   : > { %p1590_p12 = scmp.ne.s32.totalorder %s2352_s30, %s1589_s7  ;;  %p2581_p13 = scmp.ne.s32.totalorder %s2544_s12, 0 }
 0x5a3   : > { %p1591_p0 = pnand %p1590_p12, %p2581_p13 }
 0x5a4   : > { %s1097_s5 = sshll.u32 %s2577_s25, 1 }
 0x5a5   : > { %s826_s26 = sadd.s32 %s2578_s18, %s1097_s5  ;;  %s2580_s3 = smov %s2579_s17 }
 0x5a6   : > { %s1098_s4 = sshll.u32 %s826_s26, 7  ;;  %p1592_p2 = pneg %p1591_p0 }
 0x5a7   : > { %s828_s1 = scalar_lea.hbm %s2579_s17, %s1098_s4  ;;  %s1805_s18 = smov [#allocation20]  }
 0x5a8   : > { %s1593_s29 = sshll.u32 %s1805_s18, 4  ;;  %s1594_s29 = int_to_ptr.vmem [resolvable:$false] %s1593_s29 }
 0x5a9   : > { %s1595_s2 = scalar_lea.vmem %s1594_s29, 256  ;;  %p1596_p5 = scmp.lt.s32.totalorder %s2352_s30, %s1594_s29 }
 0x5aa   : > { %p1597_p3 = scmp.lt.s32.totalorder %s1595_s2, %s1589_s7 }
 0x5ac   : > { %p1598_p9 = por %p1597_p3, %p1596_p5 }
 0x5ae   : > { %p1599_p1 = pnand %p1598_p9, %p1592_p2 }
 0x5b0   : > { %1602 = shalt.err (!%p1599_p1)
}
 0x5b1   : > { %s1603_s5 = scalar_lea.hbm %s828_s1, 128  ;;  %s1607_s4 = scalar_lea.hbm %s2580_s3, 512 }
 0x5b2   : > { %p1604_p7 = scmp.ne.s32.totalorder %s828_s1, %s1603_s5  ;;  %p1608_p8 = scmp.lt.u32.totalorder %s828_s1, %s2580_s3 }
 0x5b3   : > { %p1609_p10 = scmp.lt.u32.totalorder %s1607_s4, %s1603_s5  ;;  %p1611_p12 = scmp.lt.u32.totalorder %s1603_s5, %s828_s1 }
 0x5b4   : > { %p1605_p6 = pnand %p1604_p7, %p2581_p13 }
 0x5b5   : > { %p1610_p11 = por %p1609_p10, %p1608_p8 }
 0x5b6   : > { %p1606_p4 = pneg %p1605_p6 }
 0x5b7   : > { %p1612_p0 = por %p1611_p12, %p1610_p11 }
 0x5b9   : > { %p1613_p2 = pnand %p1612_p0, %p1606_p4 }
 0x5bb   : > { %1616 = shalt.err (!%p1613_p2)
}
 0x5bc   : > { %1170 = dma.vmem_to_hbm [thread:$0]  (%p2581_p13), %s2352_s30, 128, %s828_s1, %s810_s9  }
 0x5bd   : > { %s1099_s7 = sshll.u32 %s2577_s25, 7  ;;  %s2582_s17 = scalar_lea.vmem [#allocation21], %s2283_s24 }
 0x5be   : > { %s843_s18 = sshll.u32 %s2582_s17, 4  ;;  %s2583_s23 = sld [smem:[#allocation52_spill]]  ;;  %s844_s18 = int_to_ptr.vmem [resolvable:$true] %s843_s18 }
 0x5bf   : > { %s815_s5 = scalar_lea.sflag [#allocation22], %s2280_s28  ;;  %s1617_s4 = scalar_lea.vmem %s844_s18, 128 }
 0x5c0   : > { %p1618_p5 = scmp.ne.s32.totalorder %s844_s18, %s1617_s4  ;;  %p2584_p3 = scmp.ne.s32.totalorder %s2545_s19, 0 }
 0x5c1   : > { %s1806_s12 = smov [#allocation21]  }
 0x5c2   : > { %p1619_p9 = pnand %p1618_p5, %p2584_p3  ;;  %s1621_s27 = sshll.u32 %s1806_s12, 4  ;;  %s1622_s27 = int_to_ptr.vmem [resolvable:$false] %s1621_s27 }
 0x5c3   : > { %s1623_s0 = scalar_lea.vmem %s1622_s27, 256  ;;  %p1624_p13 = scmp.lt.s32.totalorder %s844_s18, %s1622_s27 }
 0x5c4   : > { %s2381_s26 = scalar_lea.hbm %s2583_s23, %s1099_s7  ;;  %p1620_p1 = pneg %p1619_p9 }
 0x5c5   : > { %p1625_p7 = scmp.lt.s32.totalorder %s1623_s0, %s1617_s4 }
 0x5c7   : > { %p1626_p6 = por %p1625_p7, %p1624_p13 }
 0x5c9   : > { %p1627_p4 = pnand %p1626_p6, %p1620_p1 }
 0x5cb   : > { %1630 = shalt.err (!%p1627_p4)
}
 0x5cc   : > { %s1631_s28 = scalar_lea.hbm %s2381_s26, 128  ;;  %s1635_s25 = scalar_lea.hbm %s2583_s23, 256 }
 0x5cd   : > { %p1632_p8 = scmp.ne.s32.totalorder %s2381_s26, %s1631_s28  ;;  %p1636_p12 = scmp.lt.u32.totalorder %s2381_s26, %s2583_s23 }
 0x5ce   : > { %p1637_p0 = scmp.lt.u32.totalorder %s1635_s25, %s1631_s28  ;;  %p1639_p5 = scmp.lt.u32.totalorder %s1631_s28, %s2381_s26 }
 0x5cf   : > { %p1633_p10 = pnand %p1632_p8, %p2584_p3 }
 0x5d0   : > { %p1638_p2 = por %p1637_p0, %p1636_p12 }
 0x5d1   : > { %p1634_p11 = pneg %p1633_p10 }
 0x5d2   : > { %p1640_p9 = por %p1639_p5, %p1638_p2 }
 0x5d4   : > { %p1641_p1 = pnand %p1640_p9, %p1634_p11 }
 0x5d6   : > { %1644 = shalt.err (!%p1641_p1)
}
 0x5d7   : > { %1171 = dma.vmem_to_hbm [thread:$0]  (%p2584_p3), %s844_s18, 128, %s2381_s26, %s815_s5  }
 0x5d8 PF: > { %s2585_s7 = sld [smem:[#allocation30_spill]]  ;;  %p1216_p13 = scmp.ge.s32.totalorder %s1783_s22, 2 }
 0x5d9   : > { %p2586_p7 = scmp.ne.s32.totalorder %s2546_s13, 0 }
 0x5db   : > { %p1201_p6 = pnand %p1216_p13, %p2586_p7 }
 0x5de   : > { %s855_s17 = sand.u32 1, %s2585_s7  }
 0x5df   : > { %s856_s29 = scalar_lea.sflag [#allocation8], %s855_s17 }
 0x5e0   : > { %1722 = dma.done.wait (!%p1201_p6), %s856_s29, 128  }
 0x5e1   : > { %1724 = vsyncadd (!%p1201_p6), %s856_s29, 4294967168  ;;  %s864_s2 = sand.u32 1, %s1755_s15   ;;  %p2587_p4 = scmp.ne.s32.totalorder %s2547_s6, 0 }
 0x5e2   : > { %s865_s4 = scalar_lea.sflag [#allocation22], %s864_s2 }
 0x5e3   : > { %p1204_p8 = pnand %p1216_p13, %p2587_p4 }
 0x5e5   : > { %1726 = dma.done.wait (!%p1204_p8), %s865_s4, 128  }
 0x5e6   : > { %1728 = vsyncadd (!%p1204_p8), %s865_s4, 4294967168  ;;  %s37_s22 = sadd.s32 1, %s1783_s22   ;;  %s2589_s13 = sld [smem:[#allocation42_spill]] }
 0x5e7   : > { %p2409_p3 = scmp.ge.s32.totalorder %s37_s22, 6   ;;  %s2590_s12 = sld [smem:[#allocation31_spill]] }
 0x5e8   : > { %s2591_s18 = sld [smem:[#allocation40_spill]]  ;;  %s2592_s26 = sld [smem:[#allocation32_spill]] }
 0x5e9   : > { %s2593_s17 = sld [smem:[#allocation41_spill]]  ;;  %s2594_s6 = sld [smem:[#allocation38_spill]] }
 0x5ea   : > { %s2595_s5 = sld [smem:[#allocation39_spill]]  ;;  %s2597_s30 = smov %s1735_s10 }
 0x5eb   : > { %s2598_s10 = smov %s1739_s11  ;;  %s2602_s15 = smov %s1759_s16 }
 0x5ec   : > { %s2599_s11 = smov %s2589_s13  ;;  %s2600_s13 = smov %s1751_s14 }
 0x5ed   : > { %s2605_s19 = smov %s1779_s21  ;;  %36 = sbr.rel (!%p2409_p3) target bundleno = 29 (0x1d), region = 175 }
 0x5ee   : > { %s2601_s14 = smov %s2591_s18  ;;  %s2603_s16 = smov %s2592_s26 }
 0x5ef   : > { %s2604_s18 = smov %s1775_s20  ;;  %s2606_s20 = smov %s2594_s6 }
 0x5f0   : > { %s2607_s21 = smov %s2595_s5 }
 0x5f4   :  { %870 = vsyncpa [#allocation7], 1 }
 0x5f5   :  { %872 = vsyncpa [#allocation7 + $0x1], 1 }
 0x5f6   :  { %873 = vsyncpa [#allocation10], 1 }
 0x5f7   :  { %874 = vsyncpa [#allocation13], 1 }
 0x5f8   :  { %875 = vsyncpa [#allocation16], 1 }
 0x5f9   :  { %877 = vsyncpa [#allocation16 + $0x1], 1 }
 0x5fa   :  { %878 = vsyncpa [#allocation19], 1 }
 0x5fb   :  { %880 = vsyncpa [#allocation19 + $0x1], 1 }
 0x5fc   :  { %881 = vsyncpa [#allocation8], 1 }
 0x5fd   :  { %883 = vsyncpa [#allocation8 + $0x1], 1 }
 0x5fe   :  { %884 = vsyncpa [#allocation22], 1 }
 0x5ff   :  { %886 = vsyncpa [#allocation22 + $0x1], 1 }

</bundles_post_ra>
